<compile_context>
chip_gen: v5e
topology: v5e:2x2
jax: 0.10.0
libtpu: 0.0.40
codegen_flags: <defaults>
</compile_context>

<pallas_src>
from functools import partial, reduce

import jax
import jax.numpy as jnp
from jax.experimental import pallas as pl
from jax.experimental.pallas import tpu as pltpu


# --------------------------------------------------------------------------
# Tiling policy
# --------------------------------------------------------------------------
_TARGET_BLOCK_BYTES = 1 << 20          # ~1 MiB per block buffer (8 live copies ~8 MiB)
_VMEM_LIMIT_BYTES = 32 * 1024 * 1024   # conservative: fits v5e/v6e scoped and v7x physical VMEM
_FAST_PATH_BYTES = 1 << 20             # whole-state-in-one-block threshold (per array)
_MAX_FAST_GROUPS = 16                  # bound static unrolling of the half-swap kernel


def _sublane_multiple(itemsize: int) -> int:
    # 8 for f32, 16 for bf16, 32 for int8/fp8 (sublane packing of narrow dtypes)
    return max(8, 32 // itemsize)


def _row_block(rows: int, row_bytes: int, itemsize: int) -> int:
    """Row block ~_TARGET_BLOCK_BYTES, multiple of the sublane packing, or full extent."""
    sub = _sublane_multiple(itemsize)
    rb = max(1, _TARGET_BLOCK_BYTES // max(row_bytes, 1))
    rb = max(sub, (rb // sub) * sub)
    if rb >= rows:
        return rows                    # full-extent dims are always legal block dims
    return rb


# --------------------------------------------------------------------------
# Kernels
# --------------------------------------------------------------------------
def _copy_kernel(xr_ref, xi_ref, or_ref, oi_ref):
    """Aligned path: the permutation is done by the BlockSpec index_map; the
    body is a pure copy (the pipelined DMA does all the work)."""
    or_ref[...] = xr_ref[...]
    oi_ref[...] = xi_ref[...]


def _roll_swap_kernel(xr_ref, xi_ref, or_ref, oi_ref, *, s):
    """s < 128, lane width W (<=128): out[:, p] = in[:, p ^ s] done in-register
    with two XLU rolls + one VPU select; stores stay lane-dense."""
    W = xr_ref.shape[-1]
    lane = jax.lax.broadcasted_iota(jnp.int32, xr_ref.shape, dimension=xr_ref.ndim - 1)
    take_upper = (lane & s) == 0       # bit of lane index that s flips

    def swap(x):
        up = pltpu.roll(x, W - s, axis=1)   # out[p] = x[(p + s) mod W]  (no real wrap)
        dn = pltpu.roll(x, s, axis=1)       # out[p] = x[(p - s) mod W]  (no real wrap)
        return jnp.where(take_upper, up, dn)

    or_ref[...] = swap(xr_ref[...])
    oi_ref[...] = swap(xi_ref[...])


def _halfswap_kernel(xr_ref, xi_ref, or_ref, oi_ref, *, s):
    """Generic path (tiny D or small aligned states): swap the two halves of
    every contiguous 2s-wide group with statically unrolled slice copies."""
    D = xr_ref.shape[-1]
    for x_ref, o_ref in ((xr_ref, or_ref), (xi_ref, oi_ref)):
        x = x_ref[...]
        for g in range(D // (2 * s)):
            lo = 2 * g * s
            o_ref[:, lo:lo + s] = x[:, lo + s:lo + 2 * s]
            o_ref[:, lo + s:lo + 2 * s] = x[:, lo:lo + s]


# --------------------------------------------------------------------------
# Wrappers
# --------------------------------------------------------------------------
def _apply_aligned(xr, xi, s):
    """s multiple of 128: swap column blocks purely via the index_map."""
    B, D = xr.shape
    itemsize = xr.dtype.itemsize
    sub = _sublane_multiple(itemsize)

    lane_cap = _TARGET_BLOCK_BYTES // (sub * itemsize)
    lane_cap = max(128, 1 << (lane_cap.bit_length() - 1))   # power of two >= 128
    cb = min(s, lane_cap)             # power of two, >=128, divides s and D
    rb = _row_block(B, cb * itemsize, itemsize)
    bshift = s // cb                  # XOR this block index to reach the swap partner
    grid = (pl.cdiv(B, rb), D // cb)

    in_spec = pl.BlockSpec((rb, cb), lambda i, j: (i, j ^ bshift))
    out_spec = pl.BlockSpec((rb, cb), lambda i, j: (i, j))

    return pl.pallas_call(
        _copy_kernel,
        out_shape=(
            jax.ShapeDtypeStruct((B, D), xr.dtype),
            jax.ShapeDtypeStruct((B, D), xi.dtype),
        ),
        grid=grid,
        in_specs=[in_spec, in_spec],
        out_specs=(out_spec, out_spec),
        compiler_params=pltpu.CompilerParams(
            dimension_semantics=("parallel", "parallel"),
            vmem_limit_bytes=_VMEM_LIMIT_BYTES,
        ),
    )(xr, xi)


def _apply_rolled(xr, xi, s):
    """s < 128, D >= 128: reshape to 128-wide rows (free), contiguous blocks,
    in-register roll+select swap."""
    B, D = xr.shape
    W = 128
    R = (B * D) // W
    xr2 = xr.reshape(R, W)
    xi2 = xi.reshape(R, W)
    itemsize = xr.dtype.itemsize
    rb = _row_block(R, W * itemsize, itemsize)
    spec = pl.BlockSpec((rb, W), lambda i: (i, 0))

    out_r, out_i = pl.pallas_call(
        partial(_roll_swap_kernel, s=s),
        out_shape=(
            jax.ShapeDtypeStruct((R, W), xr.dtype),
            jax.ShapeDtypeStruct((R, W), xi.dtype),
        ),
        grid=(pl.cdiv(R, rb),),
        in_specs=[spec, spec],
        out_specs=(spec, spec),
        compiler_params=pltpu.CompilerParams(
            dimension_semantics=("parallel",),
            vmem_limit_bytes=_VMEM_LIMIT_BYTES,
        ),
    )(xr2, xi2)
    return out_r.reshape(B, D), out_i.reshape(B, D)


def _apply_halfswap(xr, xi, s):
    """Full-width row-tiled blocks, statically unrolled half-swap."""
    B, D = xr.shape
    itemsize = xr.dtype.itemsize
    rb = _row_block(B, D * itemsize, itemsize)
    spec = pl.BlockSpec((rb, D), lambda i: (i, 0))

    return pl.pallas_call(
        partial(_halfswap_kernel, s=s),
        out_shape=(
            jax.ShapeDtypeStruct((B, D), xr.dtype),
            jax.ShapeDtypeStruct((B, D), xi.dtype),
        ),
        grid=(pl.cdiv(B, rb),),
        in_specs=[spec, spec],
        out_specs=(spec, spec),
        compiler_params=pltpu.CompilerParams(
            dimension_semantics=("parallel",),
            vmem_limit_bytes=_VMEM_LIMIT_BYTES,
        ),
    )(xr, xi)


def apply_x_gate(state: tuple, n_qubit: int, index: int):
    """Pallas equivalent of X(n_qubit, index).forward(state). Preserves dtype."""
    xr, xi = state
    if xr.dtype != xi.dtype:
        common = jnp.promote_types(xr.dtype, xi.dtype)
        xr = xr.astype(common)
        xi = xi.astype(common)
    B, D = xr.shape
    assert xi.shape == (B, D)
    assert D == 2 ** n_qubit
    assert 0 <= index < n_qubit

    s = 2 ** (n_qubit - index - 1)     # column j swaps with column j XOR s
    itemsize = xr.dtype.itemsize

    if s < 128:
        if D >= 128:
            return _apply_rolled(xr, xi, s)
        return _apply_halfswap(xr, xi, s)
    # s >= 128: lane-aligned block swap
    if B * D * itemsize <= _FAST_PATH_BYTES and D // (2 * s) <= _MAX_FAST_GROUPS:
        # tiny state: single-step full-width block beats a multi-step pipeline
        return _apply_halfswap(xr, xi, s)
    return _apply_aligned(xr, xi, s)


# --------------------------------------------------------------------------
# Dense operator (verification only -- never used in the forward path)
# --------------------------------------------------------------------------
def _build_x_op(n_qubit: int, index: int) -> jnp.ndarray:
    id1 = jnp.eye(2 ** index, dtype=jnp.float32)
    id2 = jnp.eye(2 ** (n_qubit - index - 1), dtype=jnp.float32)
    pauli_x = jnp.array([[0.0, 1.0], [1.0, 0.0]], dtype=jnp.float32)
    return reduce(jnp.kron, [id1, pauli_x, id2])


if __name__ == "__main__":
    # (n_qubit, index, batch) -- covers all dispatch paths:
    configs = [
        (5, 2, 8),      # D=32,   s=4    -> tiny-lane half-swap path
        (8, 0, 8),      # D=256,  s=128  -> small aligned fast path (single step)
        (11, 0, 256),   # D=2048, s=1024 -> tiled aligned index_map-DMA path
        (11, 8, 256),   # D=2048, s=4    -> lane-dense roll+select path
    ]
    key = jax.random.PRNGKey(0)
    for n_qubit, index, batch in configs:
        D = 2 ** n_qubit
        key, k_re, k_im = jax.random.split(key, 3)
        x_re = jax.random.normal(k_re, (batch, D), dtype=jnp.float32)
        x_im = jax.random.normal(k_im, (batch, D), dtype=jnp.float32)

        out_re, out_im = apply_x_gate((x_re, x_im), n_qubit, index)
        jax.block_until_ready(out_re)
        jax.block_until_ready(out_im)

        # Exact reference: the permutation the dense operator encodes.
        s = 2 ** (n_qubit - index - 1)
        perm = jnp.arange(D) ^ s
        assert jnp.array_equal(out_re, x_re[:, perm]), (n_qubit, index)
        assert jnp.array_equal(out_im, x_im[:, perm]), (n_qubit, index)

        # Original dense-operator semantics (x @ kron(I, X, I)).
        op = _build_x_op(n_qubit, index)
        ref_re = jnp.matmul(x_re, op, precision=jax.lax.Precision.HIGHEST)
        ref_im = jnp.matmul(x_im, op, precision=jax.lax.Precision.HIGHEST)
        assert jnp.allclose(out_re, ref_re, atol=1e-4), (n_qubit, index)
        assert jnp.allclose(out_im, ref_im, atol=1e-4), (n_qubit, index)

    print("KERNEL_OK")
</pallas_src>

<mosaic_0001>
module attributes {stable_mosaic.version = 11 : i64} {
  func.func @_halfswap_kernel(%arg0: i32, %arg1: memref<8x32xf32, #tpu.memory_space<vmem>>, %arg2: memref<8x32xf32, #tpu.memory_space<vmem>>, %arg3: memref<8x32xf32, #tpu.memory_space<vmem>>, %arg4: memref<8x32xf32, #tpu.memory_space<vmem>>) attributes {dimension_semantics = [#tpu.dimension_semantics<parallel>], iteration_bounds = array<i64: 1>, scalar_prefetch = 0 : i64, scratch_operands = 0 : i64, tpu.core_type = #tpu.core_type<tc>, window_params = [{transform_indices = @transform_0, window_bounds = array<i64: 8, 32>}, {transform_indices = @transform_1, window_bounds = array<i64: 8, 32>}, {transform_indices = @transform_2, window_bounds = array<i64: 8, 32>}, {transform_indices = @transform_3, window_bounds = array<i64: 8, 32>}]} {
    %c0 = arith.constant 0 : index
    %c0_0 = arith.constant 0 : index
    %0 = vector.load %arg1[%c0, %c0_0] : memref<8x32xf32, #tpu.memory_space<vmem>>, vector<8x32xf32>
    %1 = vector.extract_strided_slice %0 {offsets = [0, 4], sizes = [8, 4], strides = [1, 1]} : vector<8x32xf32> to vector<8x4xf32>
    %c0_1 = arith.constant 0 : index
    %c0_2 = arith.constant 0 : index
    %2 = vector.load %arg3[%c0_1, %c0_2] : memref<8x32xf32, #tpu.memory_space<vmem>>, vector<8x4xf32>
    tpu.vector_store %arg3[%c0_1, %c0_2], %1 {strides = array<i32>} : memref<8x32xf32, #tpu.memory_space<vmem>>, vector<8x4xf32>,
    %3 = vector.extract_strided_slice %0 {offsets = [0, 0], sizes = [8, 4], strides = [1, 1]} : vector<8x32xf32> to vector<8x4xf32>
    %c0_3 = arith.constant 0 : index
    %c4 = arith.constant 4 : index
    %4 = vector.load %arg3[%c0_3, %c4] : memref<8x32xf32, #tpu.memory_space<vmem>>, vector<8x4xf32>
    tpu.vector_store %arg3[%c0_3, %c4], %3 {strides = array<i32>} : memref<8x32xf32, #tpu.memory_space<vmem>>, vector<8x4xf32>,
    %5 = vector.extract_strided_slice %0 {offsets = [0, 12], sizes = [8, 4], strides = [1, 1]} : vector<8x32xf32> to vector<8x4xf32>
    %c0_4 = arith.constant 0 : index
    %c8 = arith.constant 8 : index
    %6 = vector.load %arg3[%c0_4, %c8] : memref<8x32xf32, #tpu.memory_space<vmem>>, vector<8x4xf32>
    tpu.vector_store %arg3[%c0_4, %c8], %5 {strides = array<i32>} : memref<8x32xf32, #tpu.memory_space<vmem>>, vector<8x4xf32>,
    %7 = vector.extract_strided_slice %0 {offsets = [0, 8], sizes = [8, 4], strides = [1, 1]} : vector<8x32xf32> to vector<8x4xf32>
    %c0_5 = arith.constant 0 : index
    %c12 = arith.constant 12 : index
    %8 = vector.load %arg3[%c0_5, %c12] : memref<8x32xf32, #tpu.memory_space<vmem>>, vector<8x4xf32>
    tpu.vector_store %arg3[%c0_5, %c12], %7 {strides = array<i32>} : memref<8x32xf32, #tpu.memory_space<vmem>>, vector<8x4xf32>,
    %9 = vector.extract_strided_slice %0 {offsets = [0, 20], sizes = [8, 4], strides = [1, 1]} : vector<8x32xf32> to vector<8x4xf32>
    %c0_6 = arith.constant 0 : index
    %c16 = arith.constant 16 : index
    %10 = vector.load %arg3[%c0_6, %c16] : memref<8x32xf32, #tpu.memory_space<vmem>>, vector<8x4xf32>
    tpu.vector_store %arg3[%c0_6, %c16], %9 {strides = array<i32>} : memref<8x32xf32, #tpu.memory_space<vmem>>, vector<8x4xf32>,
    %11 = vector.extract_strided_slice %0 {offsets = [0, 16], sizes = [8, 4], strides = [1, 1]} : vector<8x32xf32> to vector<8x4xf32>
    %c0_7 = arith.constant 0 : index
    %c20 = arith.constant 20 : index
    %12 = vector.load %arg3[%c0_7, %c20] : memref<8x32xf32, #tpu.memory_space<vmem>>, vector<8x4xf32>
    tpu.vector_store %arg3[%c0_7, %c20], %11 {strides = array<i32>} : memref<8x32xf32, #tpu.memory_space<vmem>>, vector<8x4xf32>,
    %13 = vector.extract_strided_slice %0 {offsets = [0, 28], sizes = [8, 4], strides = [1, 1]} : vector<8x32xf32> to vector<8x4xf32>
    %c0_8 = arith.constant 0 : index
    %c24 = arith.constant 24 : index
    %14 = vector.load %arg3[%c0_8, %c24] : memref<8x32xf32, #tpu.memory_space<vmem>>, vector<8x4xf32>
    tpu.vector_store %arg3[%c0_8, %c24], %13 {strides = array<i32>} : memref<8x32xf32, #tpu.memory_space<vmem>>, vector<8x4xf32>,
    %15 = vector.extract_strided_slice %0 {offsets = [0, 24], sizes = [8, 4], strides = [1, 1]} : vector<8x32xf32> to vector<8x4xf32>
    %c0_9 = arith.constant 0 : index
    %c28 = arith.constant 28 : index
    %16 = vector.load %arg3[%c0_9, %c28] : memref<8x32xf32, #tpu.memory_space<vmem>>, vector<8x4xf32>
    tpu.vector_store %arg3[%c0_9, %c28], %15 {strides = array<i32>} : memref<8x32xf32, #tpu.memory_space<vmem>>, vector<8x4xf32>,
    %c0_10 = arith.constant 0 : index
    %c0_11 = arith.constant 0 : index
    %17 = vector.load %arg2[%c0_10, %c0_11] : memref<8x32xf32, #tpu.memory_space<vmem>>, vector<8x32xf32>
    %18 = vector.extract_strided_slice %17 {offsets = [0, 4], sizes = [8, 4], strides = [1, 1]} : vector<8x32xf32> to vector<8x4xf32>
    %c0_12 = arith.constant 0 : index
    %c0_13 = arith.constant 0 : index
    %19 = vector.load %arg4[%c0_12, %c0_13] : memref<8x32xf32, #tpu.memory_space<vmem>>, vector<8x4xf32>
    tpu.vector_store %arg4[%c0_12, %c0_13], %18 {strides = array<i32>} : memref<8x32xf32, #tpu.memory_space<vmem>>, vector<8x4xf32>,
    %20 = vector.extract_strided_slice %17 {offsets = [0, 0], sizes = [8, 4], strides = [1, 1]} : vector<8x32xf32> to vector<8x4xf32>
    %c0_14 = arith.constant 0 : index
    %c4_15 = arith.constant 4 : index
    %21 = vector.load %arg4[%c0_14, %c4_15] : memref<8x32xf32, #tpu.memory_space<vmem>>, vector<8x4xf32>
    tpu.vector_store %arg4[%c0_14, %c4_15], %20 {strides = array<i32>} : memref<8x32xf32, #tpu.memory_space<vmem>>, vector<8x4xf32>,
    %22 = vector.extract_strided_slice %17 {offsets = [0, 12], sizes = [8, 4], strides = [1, 1]} : vector<8x32xf32> to vector<8x4xf32>
    %c0_16 = arith.constant 0 : index
    %c8_17 = arith.constant 8 : index
    %23 = vector.load %arg4[%c0_16, %c8_17] : memref<8x32xf32, #tpu.memory_space<vmem>>, vector<8x4xf32>
    tpu.vector_store %arg4[%c0_16, %c8_17], %22 {strides = array<i32>} : memref<8x32xf32, #tpu.memory_space<vmem>>, vector<8x4xf32>,
    %24 = vector.extract_strided_slice %17 {offsets = [0, 8], sizes = [8, 4], strides = [1, 1]} : vector<8x32xf32> to vector<8x4xf32>
    %c0_18 = arith.constant 0 : index
    %c12_19 = arith.constant 12 : index
    %25 = vector.load %arg4[%c0_18, %c12_19] : memref<8x32xf32, #tpu.memory_space<vmem>>, vector<8x4xf32>
    tpu.vector_store %arg4[%c0_18, %c12_19], %24 {strides = array<i32>} : memref<8x32xf32, #tpu.memory_space<vmem>>, vector<8x4xf32>,
    %26 = vector.extract_strided_slice %17 {offsets = [0, 20], sizes = [8, 4], strides = [1, 1]} : vector<8x32xf32> to vector<8x4xf32>
    %c0_20 = arith.constant 0 : index
    %c16_21 = arith.constant 16 : index
    %27 = vector.load %arg4[%c0_20, %c16_21] : memref<8x32xf32, #tpu.memory_space<vmem>>, vector<8x4xf32>
    tpu.vector_store %arg4[%c0_20, %c16_21], %26 {strides = array<i32>} : memref<8x32xf32, #tpu.memory_space<vmem>>, vector<8x4xf32>,
    %28 = vector.extract_strided_slice %17 {offsets = [0, 16], sizes = [8, 4], strides = [1, 1]} : vector<8x32xf32> to vector<8x4xf32>
    %c0_22 = arith.constant 0 : index
    %c20_23 = arith.constant 20 : index
    %29 = vector.load %arg4[%c0_22, %c20_23] : memref<8x32xf32, #tpu.memory_space<vmem>>, vector<8x4xf32>
    tpu.vector_store %arg4[%c0_22, %c20_23], %28 {strides = array<i32>} : memref<8x32xf32, #tpu.memory_space<vmem>>, vector<8x4xf32>,
    %30 = vector.extract_strided_slice %17 {offsets = [0, 28], sizes = [8, 4], strides = [1, 1]} : vector<8x32xf32> to vector<8x4xf32>
    %c0_24 = arith.constant 0 : index
    %c24_25 = arith.constant 24 : index
    %31 = vector.load %arg4[%c0_24, %c24_25] : memref<8x32xf32, #tpu.memory_space<vmem>>, vector<8x4xf32>
    tpu.vector_store %arg4[%c0_24, %c24_25], %30 {strides = array<i32>} : memref<8x32xf32, #tpu.memory_space<vmem>>, vector<8x4xf32>,
    %32 = vector.extract_strided_slice %17 {offsets = [0, 24], sizes = [8, 4], strides = [1, 1]} : vector<8x32xf32> to vector<8x4xf32>
    %c0_26 = arith.constant 0 : index
    %c28_27 = arith.constant 28 : index
    %33 = vector.load %arg4[%c0_26, %c28_27] : memref<8x32xf32, #tpu.memory_space<vmem>>, vector<8x4xf32>
    tpu.vector_store %arg4[%c0_26, %c28_27], %32 {strides = array<i32>} : memref<8x32xf32, #tpu.memory_space<vmem>>, vector<8x4xf32>,
    return
  }
  func.func @transform_0(%arg0: i32) -> (i32, i32) {
    %c0_i32 = arith.constant 0 : i32
    %c0_i32_0 = arith.constant 0 : i32
    return %arg0, %c0_i32 : i32, i32
  }
  func.func @transform_1(%arg0: i32) -> (i32, i32) {
    %c0_i32 = arith.constant 0 : i32
    %c0_i32_0 = arith.constant 0 : i32
    return %arg0, %c0_i32 : i32, i32
  }
  func.func @transform_2(%arg0: i32) -> (i32, i32) {
    %c0_i32 = arith.constant 0 : i32
    %c0_i32_0 = arith.constant 0 : i32
    return %arg0, %c0_i32 : i32, i32
  }
  func.func @transform_3(%arg0: i32) -> (i32, i32) {
    %c0_i32 = arith.constant 0 : i32
    %c0_i32_0 = arith.constant 0 : i32
    return %arg0, %c0_i32 : i32, i32
  }
}

</mosaic_0001>

<bundles_post_ra>
// kernel: tpu_custom_call.1
= control target key start
LH: loop header
LB: loop body
LE: loop exit
PB: predicated region body
PF: predicated region fallthrough
CT: control target
= control target key end

     0   :  { %9 = vsyncpa [#allocation3], 0  ;;  %s281_s0 = inlined_call_operand.hbm [shape: f32[8,32], index: 0, kind: input, shape index: {}]   ;;  %s282_s1 = inlined_call_operand.hbm [shape: f32[8,32], index: 1, kind: input, shape index: {}]   ;;  %s283_s2 = inlined_call_operand.hbm [shape: f32[8,32], index: 2, kind: output, shape index: {0}]   ;;  %s284_s3 = inlined_call_operand.hbm [shape: f32[8,32], index: 3, kind: output, shape index: {1}]  }
   0x1   :  { %10 = vsyncpa [#allocation6], 0 }
   0x2   :  { %11 = vsyncpa [#allocation4], 0 }
   0x3   :  { %12 = vsyncpa [#allocation9], 0  ;;  %s18_s14 = sshll.u32 %s281_s0, 4  ;;  %s227_s15 = smov [#allocation2]   ;;  %s19_s14 = int_to_ptr.hbm [resolvable:$true] %s18_s14 }
   0x4   :  { %s20_s16 = sshll.u32 %s227_s15, 4  ;;  %s29_s19 = sshll.u32 %s282_s1, 4  ;;  %s21_s16 = int_to_ptr.vmem [resolvable:$true] %s20_s16  ;;  %s30_s19 = int_to_ptr.hbm [resolvable:$true] %s29_s19 }
   0x5   :  { %23 = dma.hbm_to_vmem [thread:$0]  %s19_s14, 128, %s21_s16, [#allocation3]  }
   0x6   :  { %s228_s20 = smov [#allocation5]  }
   0x7   :  { %s31_s21 = sshll.u32 %s228_s20, 4  ;;  %s32_s21 = int_to_ptr.vmem [resolvable:$true] %s31_s21 }
   0x8   :  { %34 = dma.hbm_to_vmem [thread:$0]  %s30_s19, 128, %s32_s21, [#allocation6]  }
   0x9   :  { %219 = dma.done.wait [#allocation3], 128  }
   0xa   :  { %220 = vsyncadd [#allocation3], 4294967168 }
   0xb   :  { %221 = dma.done.wait [#allocation6], 128  }
   0xc   :  { %222 = vsyncadd [#allocation6], 4294967168  ;;  %v43_v0 = vld [vmem:[#allocation2] sm:$0xff]  ;;  %s229_s0 = smov 124   ;;  %s230_s22 = smov 4   ;;  %v67_v1 = vld [vmem:[#allocation5] sm:$0xff] }
   0xd   :  { %45 = vrot.lane.b32.xlu0 %v43_v0, %s229_s0  ;;  %50 = vrot.lane.b32.xlu1 %v43_v0, %s230_s22  ;;  %vm48_vm0 = vcmask 31744   ;;  %vm53_vm1 = vcmask 64544   ;;  %vm55_vm2 = vcmask 97344   ;;  %vm57_vm3 = vcmask 130144   ;;  %s231_s1 = smov [#allocation7]   ;;  %s90_s26 = sshll.u32 %s283_s2, 4  ;;  %s91_s26 = int_to_ptr.hbm [resolvable:$true] %s90_s26 }
   0xe   :  { %vm59_vm4 = vcmask 162944   ;;  %vm61_vm5 = vcmask 195744   ;;  %s88_s23 = sshll.u32 %s231_s1, 4  ;;  %vm63_vm6 = vcmask 228544   ;;  %vm65_vm7 = vcmask 261344   ;;  %s232_s2 = smov [#allocation8]   ;;  %s89_s23 = int_to_ptr.vmem [resolvable:$true] %s88_s23 }
   0xf   :  { %s99_s27 = sshll.u32 %s232_s2, 4  ;;  %s101_s30 = sshll.u32 %s284_s3, 4  ;;  %s100_s27 = int_to_ptr.vmem [resolvable:$true] %s99_s27  ;;  %s102_s30 = int_to_ptr.hbm [resolvable:$true] %s101_s30 }
  0x15   :  { %69 = vrot.lane.b32.xlu0 %v67_v1, %s229_s0  ;;  %73 = vrot.lane.b32.xlu1 %v67_v1, %s230_s22 }
  0x7f   :  { %v46_v2 = vpop.permute.xlu0 %45  ;;  %v51_v3 = vpop.permute.xlu1 %50 }
  0x80   :  { %49 = vst.msk [vmem:[#allocation7] sm:$0xff] %vm48_vm0, %v46_v2 }
  0x81   :  { %54 = vst.msk [vmem:[#allocation7] sm:$0xff] %vm53_vm1, %v51_v3 }
  0x82   :  { %56 = vst.msk [vmem:[#allocation7] sm:$0xff] %vm55_vm2, %v46_v2 }
  0x83   :  { %58 = vst.msk [vmem:[#allocation7] sm:$0xff] %vm57_vm3, %v51_v3 }
  0x84   :  { %60 = vst.msk [vmem:[#allocation7] sm:$0xff] %vm59_vm4, %v46_v2 }
  0x85   :  { %62 = vst.msk [vmem:[#allocation7] sm:$0xff] %vm61_vm5, %v51_v3 }
  0x86   :  { %64 = vst.msk [vmem:[#allocation7] sm:$0xff] %vm63_vm6, %v46_v2 }
  0x87   :  { %v70_v4 = vpop.permute.xlu0 %69  ;;  %v74_v5 = vpop.permute.xlu1 %73  ;;  %66 = vst.msk [vmem:[#allocation7] sm:$0xff] %vm65_vm7, %v51_v3 }
  0x88   :  { %72 = vst.msk [vmem:[#allocation8] sm:$0xff] %vm48_vm0, %v70_v4  ;;  %93 = dma.vmem_to_hbm [thread:$0]  %s89_s23, 128, %s91_s26, [#allocation4]  }
  0x89   :  { %76 = vst.msk [vmem:[#allocation8] sm:$0xff] %vm53_vm1, %v74_v5 }
  0x8a   :  { %77 = vst.msk [vmem:[#allocation8] sm:$0xff] %vm55_vm2, %v70_v4 }
  0x8b   :  { %78 = vst.msk [vmem:[#allocation8] sm:$0xff] %vm57_vm3, %v74_v5 }
  0x8c   :  { %79 = vst.msk [vmem:[#allocation8] sm:$0xff] %vm59_vm4, %v70_v4 }
  0x8d   :  { %80 = vst.msk [vmem:[#allocation8] sm:$0xff] %vm61_vm5, %v74_v5 }
  0x8e   :  { %81 = vst.msk [vmem:[#allocation8] sm:$0xff] %vm63_vm6, %v70_v4 }
  0x8f   :  { %82 = vst.msk [vmem:[#allocation8] sm:$0xff] %vm65_vm7, %v74_v5 }
  0x90   :  { %104 = dma.vmem_to_hbm [thread:$0]  %s100_s27, 128, %s102_s30, [#allocation9]  }
  0x91   :  { %223 = dma.done.wait [#allocation4], 128  }
  0x92   :  { %224 = vsyncadd [#allocation4], 4294967168 }
  0x93   :  { %225 = dma.done.wait [#allocation9], 128  }
  0x94   :  { %226 = vsyncadd [#allocation9], 4294967168 }
  0x95   :  { %113 = vsyncpa [#allocation3], 1 }
  0x96   :  { %114 = vsyncpa [#allocation6], 1 }
  0x97   :  { %115 = vsyncpa [#allocation4], 1 }
  0x98   :  { %116 = vsyncpa [#allocation9], 1 }

</bundles_post_ra>
